<compile_context>
chip_gen: v7x
topology: tpu7x:2x2x1
jax: 0.10.0
libtpu: 0.0.40
codegen_flags: <defaults>
</compile_context>

<pallas_src>
import functools

import jax
import jax.numpy as jnp
from jax import lax
from jax.experimental import pallas as pl
from jax.experimental.pallas import tpu as pltpu


def _round_up(x, m):
    return (x + m - 1) // m * m


def _vmem_capacity_bytes():
    try:
        return int(pltpu.get_tpu_info().vmem_capacity_bytes)
    except Exception:
        return 64 * 1024 * 1024  # conservative default (v7x per-core VMEM)


# --------------------------------------------------------------------------
# Kernel
# --------------------------------------------------------------------------
def _make_kernel(n_hidden, seq_len, seq_padded, compute_dtype):
    """Kernel factory; closes over static configuration."""
    inv_s = 1.0 / float(seq_len)
    needs_seq_mask = seq_padded > seq_len

    def kernel(*refs):
        if n_hidden > 0:
            (x_ref, w1_ref, b1_ref, wh_ref, bh_ref, wc_ref, bc_ref,
             out_ref, acc_ref) = refs
        else:
            x_ref, w1_ref, b1_ref, wc_ref, bc_ref, out_ref, acc_ref = refs
            wh_ref = bh_ref = None

        s_idx = pl.program_id(1)
        last_s = pl.num_programs(1) - 1

        @pl.when(s_idx == 0)
        def _():
            acc_ref[...] = jnp.zeros_like(acc_ref)

        tb, ts, d = x_ref.shape
        hp = acc_ref.shape[-1]

        # Flatten (TB, TS, D) -> (TB*TS, D): one tall MXU matmul instead of TB
        # tiny batched ones.  x already arrives in compute_dtype (bf16).
        x2 = x_ref[...].reshape(tb * ts, d)

        h = jnp.dot(x2, w1_ref[...], preferred_element_type=jnp.float32)
        # bias + ReLU in f32, then store the activation in compute_dtype
        # (next matmul consumes compute_dtype anyway -> numerically neutral,
        # halves the live layer-to-layer footprint).
        h = jnp.maximum(h + b1_ref[...], 0.0).astype(compute_dtype)

        for l in range(n_hidden):  # static unroll over the hidden stack
            h = jnp.dot(h, wh_ref[l], preferred_element_type=jnp.float32)
            h = jnp.maximum(h + bh_ref[l], 0.0).astype(compute_dtype)

        h3 = h.reshape(tb, ts, hp)

        if needs_seq_mask:
            # Only the final seq tile contains padded positions; mask only there.
            @pl.when(s_idx != last_s)
            def _():
                acc_ref[...] += jnp.sum(h3.astype(jnp.float32), axis=1)

            @pl.when(s_idx == last_s)
            def _():
                seq_pos = (s_idx * ts
                           + lax.broadcasted_iota(jnp.int32, (1, ts, 1), 1))
                hm = jnp.where(seq_pos < seq_len, h3, 0).astype(jnp.float32)
                acc_ref[...] += jnp.sum(hm, axis=1)
        else:
            acc_ref[...] += jnp.sum(h3.astype(jnp.float32), axis=1)

        @pl.when(s_idx == last_s)
        def _():
            pooled = acc_ref[...] * inv_s                      # mean over S
            logits = jnp.dot(pooled.astype(compute_dtype), wc_ref[...],
                             preferred_element_type=jnp.float32) + bc_ref[...]
            z = logits - jnp.max(logits, axis=-1, keepdims=True)
            e = jnp.exp(z)
            denom = jnp.sum(e, axis=-1, keepdims=True)
            # Exact normalization: this epilogue runs once per batch tile, so
            # an exact divide costs essentially nothing.
            out_ref[...] = (e / denom).astype(out_ref.dtype)

    return kernel


# --------------------------------------------------------------------------
# Tiling / VMEM budgeting
# --------------------------------------------------------------------------
def _weight_vmem_bytes(D, Hp, Cp, n_hidden, wbuf):
    # bf16 weights + f32 biases, times the buffering factor.
    wt = 2 * (D * Hp + n_hidden * Hp * Hp + Hp * Cp)
    bs = 4 * ((1 + n_hidden) * Hp + Cp)
    return wbuf * (wt + bs)


def _per_row_bytes(TS, D, Hp, Cp, n_hidden):
    act_bytes = 8 if n_hidden > 0 else 6   # peak live h: f32 dot result + bf16 h
    return (2 * TS * D * 2      # x tile, double buffered, bf16
            + TS * Hp * act_bytes
            + 2 * Cp * 4        # output tile, double buffered
            + Hp * 4)           # accumulator scratch row


def _choose_tile_s(S, max_tile=512):
    Sa = _round_up(S, 8)
    if Sa <= max_tile:
        return Sa               # whole sequence in one step (fat, few steps)
    for cand in range(max_tile, 63, -8):   # prefer a divisor of S -> no seq pad
        if S % cand == 0:
            return cand
    return 256                  # no nice divisor: big tile + mask on last tile


def _choose_tile_b(B, TS, D, Hp, Cp, n_hidden, wbytes, budget_bytes):
    per_row = _per_row_bytes(TS, D, Hp, Cp, n_hidden)
    tb = 8
    for cand in (512, 256, 128, 64, 32, 16, 8):
        if wbytes + cand * per_row <= budget_bytes:
            tb = cand
            break
    # Minimize batch padding and keep >=2 batch tiles so both v7x TensorCores
    # get work (costs ~nothing on v5e/v6e).
    tb = min(tb, _round_up(B, 8))
    if B > 8:
        tb = min(tb, _round_up((B + 1) // 2, 8))
    return max(tb, 8)


# --------------------------------------------------------------------------
# Wrapper
# --------------------------------------------------------------------------
def annnet_forward(x, w1, b1, wh, bh, wc, bc, *,
                   compute_dtype=jnp.bfloat16, single_buffer_weights=True):
    """Pallas forward pass matching torch ANNnet.forward (softmax probabilities)."""
    B, S, D = x.shape
    H = w1.shape[1]
    C = wc.shape[1]
    n_hidden = 0 if (wh is None or wh.shape[0] == 0) else int(wh.shape[0])

    # Lane-align feature dims.  Zero padding is semantically transparent:
    # padded hidden units stay exactly 0 through every Linear+ReLU, and padded
    # classes get a -1e30 bias so softmax assigns them zero mass.
    Hp = _round_up(H, 128)
    Cp = _round_up(C, 128)

    # Single-buffer grid-constant weights when supported by this Pallas build.
    resident = {}
    wbuf = 2
    if single_buffer_weights:
        try:
            _probe = pl.BlockSpec((8, 128), lambda i, s: (0, 0),
                                  pipeline_mode=pl.Buffered(1))
            del _probe
            resident = dict(pipeline_mode=pl.Buffered(1))
            wbuf = 1
        except Exception:
            resident = {}
            wbuf = 2

    TS = _choose_tile_s(S)
    Sp = _round_up(S, TS)

    vmem_cap = _vmem_capacity_bytes()
    budget = int(vmem_cap * 0.70)   # ~90 MiB on v5e/v6e, ~45 MiB on v7x
    wbytes = _weight_vmem_bytes(D, Hp, Cp, n_hidden, wbuf)
    # TODO(synk): if wbytes ever exceeds ~40% of VMEM (very deep/wide hidden
    # stacks on v7x), stream wh per layer with manual make_async_copy instead
    # of keeping all hidden weights VMEM-resident.
    TB = _choose_tile_b(B, TS, D, Hp, Cp, n_hidden, wbytes, budget)
    Bp = _round_up(B, TB)
    grid = (Bp // TB, Sp // TS)

    f32 = jnp.float32
    cd = compute_dtype

    # Stream x in compute dtype; skip the pad copy entirely when aligned,
    # otherwise fuse the cast with the pad (single wrapper pass).
    if Bp == B and Sp == S:
        xp = x.astype(cd)
    else:
        xp = jnp.pad(x.astype(cd), ((0, Bp - B), (0, Sp - S), (0, 0)))

    w1p = jnp.pad(w1, ((0, 0), (0, Hp - H))).astype(cd)
    b1p = jnp.pad(b1.reshape(1, H).astype(f32), ((0, 0), (0, Hp - H)))
    wcp = jnp.pad(wc, ((0, Hp - H), (0, Cp - C))).astype(cd)
    bcp = jnp.pad(bc.reshape(1, C).astype(f32), ((0, 0), (0, Cp - C)),
                  constant_values=-1e30)

    const2 = lambda i, s: (0, 0)
    const3 = lambda i, s: (0, 0, 0)

    in_specs = [
        pl.BlockSpec((TB, TS, D), lambda i, s: (i, s, 0)),     # x: tiled / pipelined
        pl.BlockSpec((D, Hp), const2, **resident),             # weights: resident
        pl.BlockSpec((1, Hp), const2, **resident),
    ]
    args = [xp, w1p, b1p]
    if n_hidden > 0:
        whp = jnp.pad(wh, ((0, 0), (0, Hp - H), (0, Hp - H))).astype(cd)
        bhp = jnp.pad(bh.reshape(n_hidden, 1, H).astype(f32),
                      ((0, 0), (0, 0), (0, Hp - H)))
        in_specs += [pl.BlockSpec((n_hidden, Hp, Hp), const3, **resident),
                     pl.BlockSpec((n_hidden, 1, Hp), const3, **resident)]
        args += [whp, bhp]
    in_specs += [pl.BlockSpec((Hp, Cp), const2, **resident),
                 pl.BlockSpec((1, Cp), const2, **resident)]
    args += [wcp, bcp]

    est = wbytes + TB * _per_row_bytes(TS, D, Hp, Cp, n_hidden)
    vmem_limit = int(min(int(vmem_cap * 0.8),
                         max(2 * est + (8 << 20), 32 * 1024 * 1024)))

    kernel = _make_kernel(n_hidden, S, Sp, cd)

    out_padded = pl.pallas_call(
        kernel,
        out_shape=jax.ShapeDtypeStruct((Bp, Cp), jnp.float32),
        grid_spec=pltpu.PrefetchScalarGridSpec(
            num_scalar_prefetch=0,
            grid=grid,
            in_specs=in_specs,
            out_specs=pl.BlockSpec((TB, Cp), lambda i, s: (i, 0)),
            scratch_shapes=[pltpu.VMEM((TB, Hp), jnp.float32)],
        ),
        compiler_params=pltpu.CompilerParams(
            dimension_semantics=("parallel", "arbitrary"),
            vmem_limit_bytes=vmem_limit,
        ),
    )(*args)

    return out_padded[:B, :C]


# --------------------------------------------------------------------------
# Reference + test harness
# --------------------------------------------------------------------------
def init_params(key, in_dim, hidden_dim, n_layer, n_class):
    """Deterministic PyTorch-style uniform(+-1/sqrt(fan_in)) init."""
    keys = jax.random.split(key, 6)
    n_hidden = max(n_layer - 1, 0)

    def uni(k, shape, fan_in):
        bound = 1.0 / jnp.sqrt(jnp.float32(fan_in))
        return jax.random.uniform(k, shape, jnp.float32, -bound, bound)

    w1 = uni(keys[0], (in_dim, hidden_dim), in_dim)
    b1 = uni(keys[1], (hidden_dim,), in_dim)
    wh = uni(keys[2], (n_hidden, hidden_dim, hidden_dim), hidden_dim)
    bh = uni(keys[3], (n_hidden, hidden_dim), hidden_dim)
    wc = uni(keys[4], (hidden_dim, n_class), hidden_dim)
    bc = uni(keys[5], (n_class,), hidden_dim)
    return w1, b1, wh, bh, wc, bc


def reference_forward(x, w1, b1, wh, bh, wc, bc):
    h = jnp.maximum(jnp.einsum("bsd,dh->bsh", x, w1) + b1, 0.0)
    for i in range(wh.shape[0]):
        h = jnp.maximum(jnp.einsum("bsh,hk->bsk", h, wh[i]) + bh[i], 0.0)
    m = jnp.mean(h, axis=1)
    logits = m @ wc + bc
    return jax.nn.softmax(logits, axis=1)


if __name__ == "__main__":
    B, S = 2, 8
    in_dim, hidden_dim, n_layer, n_class = 16, 32, 3, 4

    key = jax.random.PRNGKey(0)
    kx, kp = jax.random.split(key)
    x = jax.random.normal(kx, (B, S, in_dim), dtype=jnp.float32)
    params = init_params(kp, in_dim, hidden_dim, n_layer, n_class)

    fwd = jax.jit(annnet_forward)
    try:
        out = jax.block_until_ready(fwd(x, *params))
    except Exception:
        # Fallback for Pallas builds that reject single-buffered resident specs.
        fwd = jax.jit(functools.partial(annnet_forward,
                                        single_buffer_weights=False))
        out = jax.block_until_ready(fwd(x, *params))

    ref = reference_forward(x, *params)
    assert out.shape == (B, n_class)
    assert bool(jnp.all(jnp.isfinite(out)))
    assert bool(jnp.allclose(jnp.sum(out, axis=1), 1.0, atol=1e-3))
    # bf16 matmuls / activations (f32 accumulation) -> looser tolerance than
    # the pure-f32 reference.
    assert bool(jnp.allclose(out, ref, atol=2e-2, rtol=2e-2)), "mismatch vs reference"

    print("KERNEL_OK")
</pallas_src>

<mosaic_0001>
module attributes {stable_mosaic.version = 11 : i64} {
  func.func @kernel(%arg0: i32, %arg1: i32, %arg2: memref<8x8x16xbf16, #tpu.memory_space<vmem>>, %arg3: memref<16x128xbf16, #tpu.memory_space<vmem>>, %arg4: memref<1x128xf32, #tpu.memory_space<vmem>>, %arg5: memref<2x128x128xbf16, #tpu.memory_space<vmem>>, %arg6: memref<2x1x128xf32, #tpu.memory_space<vmem>>, %arg7: memref<128x128xbf16, #tpu.memory_space<vmem>>, %arg8: memref<1x128xf32, #tpu.memory_space<vmem>>, %arg9: memref<8x128xf32, #tpu.memory_space<vmem>>, %arg10: memref<8x128xf32, #tpu.memory_space<vmem>>) attributes {dimension_semantics = [#tpu.dimension_semantics<parallel>, #tpu.dimension_semantics<arbitrary>], iteration_bounds = array<i64: 1, 1>, scalar_prefetch = 0 : i64, scratch_operands = 1 : i64, tpu.core_type = #tpu.core_type<tc>, window_params = [{transform_indices = @transform_0, window_bounds = array<i64: 8, 8, 16>}, {pipeline_mode = #tpu.pipeline_mode<synchronous>, transform_indices = @transform_1, window_bounds = array<i64: 16, 128>}, {pipeline_mode = #tpu.pipeline_mode<synchronous>, transform_indices = @transform_2, window_bounds = array<i64: 1, 128>}, {pipeline_mode = #tpu.pipeline_mode<synchronous>, transform_indices = @transform_3, window_bounds = array<i64: 2, 128, 128>}, {pipeline_mode = #tpu.pipeline_mode<synchronous>, transform_indices = @transform_4, window_bounds = array<i64: 2, 1, 128>}, {pipeline_mode = #tpu.pipeline_mode<synchronous>, transform_indices = @transform_5, window_bounds = array<i64: 128, 128>}, {pipeline_mode = #tpu.pipeline_mode<synchronous>, transform_indices = @transform_6, window_bounds = array<i64: 1, 128>}, {transform_indices = @transform_7, window_bounds = array<i64: 8, 128>}]} {
    %c0_i32 = arith.constant 0 : i32
    %0 = arith.cmpi eq, %arg1, %c0_i32 : i32
    %1 = arith.extui %0 : i1 to i32
    %c0_i32_0 = arith.constant 0 : i32
    %2 = arith.cmpi ne, %1, %c0_i32_0 : i32
    scf.if %2 {
      %cst_30 = arith.constant 0.000000e+00 : f32
      %42 = vector.broadcast %cst_30 : f32 to vector<8x128xf32>
      %c0_31 = arith.constant 0 : index
      %c0_32 = arith.constant 0 : index
      %43 = vector.load %arg10[%c0_31, %c0_32] : memref<8x128xf32, #tpu.memory_space<vmem>>, vector<8x128xf32>
      tpu.vector_store %arg10[%c0_31, %c0_32], %42 {strides = array<i32>} : memref<8x128xf32, #tpu.memory_space<vmem>>, vector<8x128xf32>,
    } else {
    }
    %c0 = arith.constant 0 : index
    %c0_1 = arith.constant 0 : index
    %c0_2 = arith.constant 0 : index
    %3 = vector.load %arg2[%c0, %c0_1, %c0_2] : memref<8x8x16xbf16, #tpu.memory_space<vmem>>, vector<8x8x16xbf16>
    %4 = vector.shape_cast %3 : vector<8x8x16xbf16> to vector<64x16xbf16>
    %c0_3 = arith.constant 0 : index
    %c0_4 = arith.constant 0 : index
    %5 = vector.load %arg3[%c0_3, %c0_4] : memref<16x128xbf16, #tpu.memory_space<vmem>>, vector<16x128xbf16>
    %cst = arith.constant dense<0.000000e+00> : vector<64x128xf32>
    %6 = tpu.matmul %4, %5, %cst {dimension_numbers = #tpu.dot_dimension_numbers<[1], [0], [0], [1], [0, 0, 1, 1], [], []>} : vector<64x16xbf16>, vector<16x128xbf16>, vector<64x128xf32> -> vector<64x128xf32>
    %c0_5 = arith.constant 0 : index
    %c0_6 = arith.constant 0 : index
    %7 = vector.load %arg4[%c0_5, %c0_6] : memref<1x128xf32, #tpu.memory_space<vmem>>, vector<1x128xf32>
    %8 = vector.broadcast %7 : vector<1x128xf32> to vector<64x128xf32>
    %9 = arith.addf %6, %8 : vector<64x128xf32>
    %cst_7 = arith.constant 0.000000e+00 : f32
    %10 = vector.broadcast %cst_7 : f32 to vector<64x128xf32>
    %11 = arith.maximumf %9, %10 : vector<64x128xf32>
    %12 = arith.truncf %11 : vector<64x128xf32> to vector<64x128xbf16>
    %c0_8 = arith.constant 0 : index
    %c0_9 = arith.constant 0 : index
    %c0_10 = arith.constant 0 : index
    %13 = vector.load %arg5[%c0_8, %c0_9, %c0_10] : memref<2x128x128xbf16, #tpu.memory_space<vmem>>, vector<1x128x128xbf16>
    %14 = vector.shape_cast %13 : vector<1x128x128xbf16> to vector<128x128xbf16>
    %cst_11 = arith.constant dense<0.000000e+00> : vector<64x128xf32>
    %15 = tpu.matmul %12, %14, %cst_11 {dimension_numbers = #tpu.dot_dimension_numbers<[1], [0], [0], [1], [0, 0, 1, 1], [], []>} : vector<64x128xbf16>, vector<128x128xbf16>, vector<64x128xf32> -> vector<64x128xf32>
    %c0_12 = arith.constant 0 : index
    %c0_13 = arith.constant 0 : index
    %c0_14 = arith.constant 0 : index
    %16 = vector.load %arg6[%c0_12, %c0_13, %c0_14] : memref<2x1x128xf32, #tpu.memory_space<vmem>>, vector<1x1x128xf32>
    %17 = vector.shape_cast %16 : vector<1x1x128xf32> to vector<1x128xf32>
    %18 = vector.broadcast %17 : vector<1x128xf32> to vector<64x128xf32>
    %19 = arith.addf %15, %18 : vector<64x128xf32>
    %cst_15 = arith.constant 0.000000e+00 : f32
    %20 = vector.broadcast %cst_15 : f32 to vector<64x128xf32>
    %21 = arith.maximumf %19, %20 : vector<64x128xf32>
    %22 = arith.truncf %21 : vector<64x128xf32> to vector<64x128xbf16>
    %c1 = arith.constant 1 : index
    %c0_16 = arith.constant 0 : index
    %c0_17 = arith.constant 0 : index
    %23 = vector.load %arg5[%c1, %c0_16, %c0_17] : memref<2x128x128xbf16, #tpu.memory_space<vmem>>, vector<1x128x128xbf16>
    %24 = vector.shape_cast %23 : vector<1x128x128xbf16> to vector<128x128xbf16>
    %cst_18 = arith.constant dense<0.000000e+00> : vector<64x128xf32>
    %25 = tpu.matmul %22, %24, %cst_18 {dimension_numbers = #tpu.dot_dimension_numbers<[1], [0], [0], [1], [0, 0, 1, 1], [], []>} : vector<64x128xbf16>, vector<128x128xbf16>, vector<64x128xf32> -> vector<64x128xf32>
    %c1_19 = arith.constant 1 : index
    %c0_20 = arith.constant 0 : index
    %c0_21 = arith.constant 0 : index
    %26 = vector.load %arg6[%c1_19, %c0_20, %c0_21] : memref<2x1x128xf32, #tpu.memory_space<vmem>>, vector<1x1x128xf32>
    %27 = vector.shape_cast %26 : vector<1x1x128xf32> to vector<1x128xf32>
    %28 = vector.broadcast %27 : vector<1x128xf32> to vector<64x128xf32>
    %29 = arith.addf %25, %28 : vector<64x128xf32>
    %cst_22 = arith.constant 0.000000e+00 : f32
    %30 = vector.broadcast %cst_22 : f32 to vector<64x128xf32>
    %31 = arith.maximumf %29, %30 : vector<64x128xf32>
    %32 = arith.truncf %31 : vector<64x128xf32> to vector<64x128xbf16>
    %33 = vector.shape_cast %32 : vector<64x128xbf16> to vector<8x8x128xbf16>
    %c0_23 = arith.constant 0 : index
    %c0_24 = arith.constant 0 : index
    %34 = vector.load %arg10[%c0_23, %c0_24] : memref<8x128xf32, #tpu.memory_space<vmem>>, vector<8x128xf32>
    %35 = arith.extf %33 : vector<8x8x128xbf16> to vector<8x8x128xf32>
    %cst_25 = arith.constant dense<0.000000e+00> : vector<8x128xf32>
    %36 = vector.multi_reduction <add>, %35, %cst_25 [1] : vector<8x8x128xf32> to vector<8x128xf32>
    %37 = arith.addf %34, %36 : vector<8x128xf32>
    %c0_26 = arith.constant 0 : index
    %c0_27 = arith.constant 0 : index
    %38 = vector.load %arg10[%c0_26, %c0_27] : memref<8x128xf32, #tpu.memory_space<vmem>>, vector<8x128xf32>
    tpu.vector_store %arg10[%c0_26, %c0_27], %37 {strides = array<i32>} : memref<8x128xf32, #tpu.memory_space<vmem>>, vector<8x128xf32>,
    %c0_i32_28 = arith.constant 0 : i32
    %39 = arith.cmpi eq, %arg1, %c0_i32_28 : i32
    %40 = arith.extui %39 : i1 to i32
    %c0_i32_29 = arith.constant 0 : i32
    %41 = arith.cmpi ne, %40, %c0_i32_29 : i32
    scf.if %41 {
      %c0_30 = arith.constant 0 : index
      %c0_31 = arith.constant 0 : index
      %42 = vector.load %arg10[%c0_30, %c0_31] : memref<8x128xf32, #tpu.memory_space<vmem>>, vector<8x128xf32>
      %cst_32 = arith.constant 1.250000e-01 : f32
      %43 = vector.broadcast %cst_32 : f32 to vector<8x128xf32>
      %44 = arith.mulf %42, %43 : vector<8x128xf32>
      %45 = arith.truncf %44 : vector<8x128xf32> to vector<8x128xbf16>
      %c0_33 = arith.constant 0 : index
      %c0_34 = arith.constant 0 : index
      %46 = vector.load %arg7[%c0_33, %c0_34] : memref<128x128xbf16, #tpu.memory_space<vmem>>, vector<128x128xbf16>
      %cst_35 = arith.constant dense<0.000000e+00> : vector<8x128xf32>
      %47 = tpu.matmul %45, %46, %cst_35 {dimension_numbers = #tpu.dot_dimension_numbers<[1], [0], [0], [1], [0, 0, 1, 1], [], []>} : vector<8x128xbf16>, vector<128x128xbf16>, vector<8x128xf32> -> vector<8x128xf32>
      %c0_36 = arith.constant 0 : index
      %c0_37 = arith.constant 0 : index
      %48 = vector.load %arg8[%c0_36, %c0_37] : memref<1x128xf32, #tpu.memory_space<vmem>>, vector<1x128xf32>
      %49 = vector.broadcast %48 : vector<1x128xf32> to vector<8x128xf32>
      %50 = arith.addf %47, %49 : vector<8x128xf32>
      %cst_38 = arith.constant dense<0xFF800000> : vector<8xf32>
      %51 = vector.multi_reduction <maximumf>, %50, %cst_38 [1] : vector<8x128xf32> to vector<8xf32>
      %52 = vector.shape_cast %51 : vector<8xf32> to vector<8x1xf32>
      %53 = vector.broadcast %52 : vector<8x1xf32> to vector<8x128xf32>
      %54 = arith.subf %50, %53 : vector<8x128xf32>
      %55 = math.exp %54 : vector<8x128xf32>
      %cst_39 = arith.constant dense<0.000000e+00> : vector<8xf32>
      %56 = vector.multi_reduction <add>, %55, %cst_39 [1] : vector<8x128xf32> to vector<8xf32>
      %57 = vector.shape_cast %56 : vector<8xf32> to vector<8x1xf32>
      %58 = vector.broadcast %57 : vector<8x1xf32> to vector<8x128xf32>
      %59 = arith.divf %55, %58 : vector<8x128xf32>
      %c0_40 = arith.constant 0 : index
      %c0_41 = arith.constant 0 : index
      %60 = vector.load %arg9[%c0_40, %c0_41] : memref<8x128xf32, #tpu.memory_space<vmem>>, vector<8x128xf32>
      tpu.vector_store %arg9[%c0_40, %c0_41], %59 {strides = array<i32>} : memref<8x128xf32, #tpu.memory_space<vmem>>, vector<8x128xf32>,
    } else {
    }
    return
  }
  func.func @transform_0(%arg0: i32, %arg1: i32) -> (i32, i32, i32) {
    %c0_i32 = arith.constant 0 : i32
    %c0_i32_0 = arith.constant 0 : i32
    return %arg0, %arg1, %c0_i32 : i32, i32, i32
  }
  func.func @transform_1(%arg0: i32, %arg1: i32) -> (i32, i32) {
    %c0_i32 = arith.constant 0 : i32
    %c0_i32_0 = arith.constant 0 : i32
    %c0_i32_1 = arith.constant 0 : i32
    return %c0_i32, %c0_i32_0 : i32, i32
  }
  func.func @transform_2(%arg0: i32, %arg1: i32) -> (i32, i32) {
    %c0_i32 = arith.constant 0 : i32
    %c0_i32_0 = arith.constant 0 : i32
    %c0_i32_1 = arith.constant 0 : i32
    return %c0_i32, %c0_i32_0 : i32, i32
  }
  func.func @transform_3(%arg0: i32, %arg1: i32) -> (i32, i32, i32) {
    %c0_i32 = arith.constant 0 : i32
    %c0_i32_0 = arith.constant 0 : i32
    %c0_i32_1 = arith.constant 0 : i32
    %c0_i32_2 = arith.constant 0 : i32
    return %c0_i32, %c0_i32_0, %c0_i32_1 : i32, i32, i32
  }
  func.func @transform_4(%arg0: i32, %arg1: i32) -> (i32, i32, i32) {
    %c0_i32 = arith.constant 0 : i32
    %c0_i32_0 = arith.constant 0 : i32
    %c0_i32_1 = arith.constant 0 : i32
    %c0_i32_2 = arith.constant 0 : i32
    return %c0_i32, %c0_i32_0, %c0_i32_1 : i32, i32, i32
  }
  func.func @transform_5(%arg0: i32, %arg1: i32) -> (i32, i32) {
    %c0_i32 = arith.constant 0 : i32
    %c0_i32_0 = arith.constant 0 : i32
    %c0_i32_1 = arith.constant 0 : i32
    return %c0_i32, %c0_i32_0 : i32, i32
  }
  func.func @transform_6(%arg0: i32, %arg1: i32) -> (i32, i32) {
    %c0_i32 = arith.constant 0 : i32
    %c0_i32_0 = arith.constant 0 : i32
    %c0_i32_1 = arith.constant 0 : i32
    return %c0_i32, %c0_i32_0 : i32, i32
  }
  func.func @transform_7(%arg0: i32, %arg1: i32) -> (i32, i32) {
    %c0_i32 = arith.constant 0 : i32
    %c0_i32_0 = arith.constant 0 : i32
    return %arg0, %c0_i32 : i32, i32
  }
}

module attributes {stable_mosaic.version = 11 : i64} {
  func.func @kernel(%arg0: i32, %arg1: i32, %arg2: memref<8x8x16xbf16, #tpu.memory_space<vmem>>, %arg3: memref<16x128xbf16, #tpu.memory_space<vmem>>, %arg4: memref<1x128xf32, #tpu.memory_space<vmem>>, %arg5: memref<2x128x128xbf16, #tpu.memory_space<vmem>>, %arg6: memref<2x1x128xf32, #tpu.memory_space<vmem>>, %arg7: memref<128x128xbf16, #tpu.memory_space<vmem>>, %arg8: memref<1x128xf32, #tpu.memory_space<vmem>>, %arg9: memref<8x128xf32, #tpu.memory_space<vmem>>, %arg10: memref<8x128xf32, #tpu.memory_space<vmem>>) attributes {dimension_semantics = [#tpu.dimension_semantics<parallel>, #tpu.dimension_semantics<arbitrary>], iteration_bounds = array<i64: 1, 1>, scalar_prefetch = 0 : i64, scratch_operands = 1 : i64, tpu.core_type = #tpu.core_type<tc>, window_params = [{transform_indices = @transform_0, window_bounds = array<i64: 8, 8, 16>}, {pipeline_mode = #tpu.pipeline_mode<synchronous>, transform_indices = @transform_1, window_bounds = array<i64: 16, 128>}, {pipeline_mode = #tpu.pipeline_mode<synchronous>, transform_indices = @transform_2, window_bounds = array<i64: 1, 128>}, {pipeline_mode = #tpu.pipeline_mode<synchronous>, transform_indices = @transform_3, window_bounds = array<i64: 2, 128, 128>}, {pipeline_mode = #tpu.pipeline_mode<synchronous>, transform_indices = @transform_4, window_bounds = array<i64: 2, 1, 128>}, {pipeline_mode = #tpu.pipeline_mode<synchronous>, transform_indices = @transform_5, window_bounds = array<i64: 128, 128>}, {pipeline_mode = #tpu.pipeline_mode<synchronous>, transform_indices = @transform_6, window_bounds = array<i64: 1, 128>}, {transform_indices = @transform_7, window_bounds = array<i64: 8, 128>}]} {
    %c0_i32 = arith.constant 0 : i32
    %0 = arith.cmpi eq, %arg1, %c0_i32 : i32
    %1 = arith.extui %0 : i1 to i32
    %c0_i32_0 = arith.constant 0 : i32
    %2 = arith.cmpi ne, %1, %c0_i32_0 : i32
    scf.if %2 {
      %cst_30 = arith.constant 0.000000e+00 : f32
      %42 = vector.broadcast %cst_30 : f32 to vector<8x128xf32>
      %c0_31 = arith.constant 0 : index
      %c0_32 = arith.constant 0 : index
      %43 = vector.load %arg10[%c0_31, %c0_32] : memref<8x128xf32, #tpu.memory_space<vmem>>, vector<8x128xf32>
      tpu.vector_store %arg10[%c0_31, %c0_32], %42 {strides = array<i32>} : memref<8x128xf32, #tpu.memory_space<vmem>>, vector<8x128xf32>,
    } else {
    }
    %c0 = arith.constant 0 : index
    %c0_1 = arith.constant 0 : index
    %c0_2 = arith.constant 0 : index
    %3 = vector.load %arg2[%c0, %c0_1, %c0_2] : memref<8x8x16xbf16, #tpu.memory_space<vmem>>, vector<8x8x16xbf16>
    %4 = vector.shape_cast %3 : vector<8x8x16xbf16> to vector<64x16xbf16>
    %c0_3 = arith.constant 0 : index
    %c0_4 = arith.constant 0 : index
    %5 = vector.load %arg3[%c0_3, %c0_4] : memref<16x128xbf16, #tpu.memory_space<vmem>>, vector<16x128xbf16>
    %cst = arith.constant dense<0.000000e+00> : vector<64x128xf32>
    %6 = tpu.matmul %4, %5, %cst {dimension_numbers = #tpu.dot_dimension_numbers<[1], [0], [0], [1], [0, 0, 1, 1], [], []>} : vector<64x16xbf16>, vector<16x128xbf16>, vector<64x128xf32> -> vector<64x128xf32>
    %c0_5 = arith.constant 0 : index
    %c0_6 = arith.constant 0 : index
    %7 = vector.load %arg4[%c0_5, %c0_6] : memref<1x128xf32, #tpu.memory_space<vmem>>, vector<1x128xf32>
    %8 = vector.broadcast %7 : vector<1x128xf32> to vector<64x128xf32>
    %9 = arith.addf %6, %8 : vector<64x128xf32>
    %cst_7 = arith.constant 0.000000e+00 : f32
    %10 = vector.broadcast %cst_7 : f32 to vector<64x128xf32>
    %11 = arith.maximumf %9, %10 : vector<64x128xf32>
    %12 = arith.truncf %11 : vector<64x128xf32> to vector<64x128xbf16>
    %c0_8 = arith.constant 0 : index
    %c0_9 = arith.constant 0 : index
    %c0_10 = arith.constant 0 : index
    %13 = vector.load %arg5[%c0_8, %c0_9, %c0_10] : memref<2x128x128xbf16, #tpu.memory_space<vmem>>, vector<1x128x128xbf16>
    %14 = vector.shape_cast %13 : vector<1x128x128xbf16> to vector<128x128xbf16>
    %cst_11 = arith.constant dense<0.000000e+00> : vector<64x128xf32>
    %15 = tpu.matmul %12, %14, %cst_11 {dimension_numbers = #tpu.dot_dimension_numbers<[1], [0], [0], [1], [0, 0, 1, 1], [], []>} : vector<64x128xbf16>, vector<128x128xbf16>, vector<64x128xf32> -> vector<64x128xf32>
    %c0_12 = arith.constant 0 : index
    %c0_13 = arith.constant 0 : index
    %c0_14 = arith.constant 0 : index
    %16 = vector.load %arg6[%c0_12, %c0_13, %c0_14] : memref<2x1x128xf32, #tpu.memory_space<vmem>>, vector<1x1x128xf32>
    %17 = vector.shape_cast %16 : vector<1x1x128xf32> to vector<1x128xf32>
    %18 = vector.broadcast %17 : vector<1x128xf32> to vector<64x128xf32>
    %19 = arith.addf %15, %18 : vector<64x128xf32>
    %cst_15 = arith.constant 0.000000e+00 : f32
    %20 = vector.broadcast %cst_15 : f32 to vector<64x128xf32>
    %21 = arith.maximumf %19, %20 : vector<64x128xf32>
    %22 = arith.truncf %21 : vector<64x128xf32> to vector<64x128xbf16>
    %c1 = arith.constant 1 : index
    %c0_16 = arith.constant 0 : index
    %c0_17 = arith.constant 0 : index
    %23 = vector.load %arg5[%c1, %c0_16, %c0_17] : memref<2x128x128xbf16, #tpu.memory_space<vmem>>, vector<1x128x128xbf16>
    %24 = vector.shape_cast %23 : vector<1x128x128xbf16> to vector<128x128xbf16>
    %cst_18 = arith.constant dense<0.000000e+00> : vector<64x128xf32>
    %25 = tpu.matmul %22, %24, %cst_18 {dimension_numbers = #tpu.dot_dimension_numbers<[1], [0], [0], [1], [0, 0, 1, 1], [], []>} : vector<64x128xbf16>, vector<128x128xbf16>, vector<64x128xf32> -> vector<64x128xf32>
    %c1_19 = arith.constant 1 : index
    %c0_20 = arith.constant 0 : index
    %c0_21 = arith.constant 0 : index
    %26 = vector.load %arg6[%c1_19, %c0_20, %c0_21] : memref<2x1x128xf32, #tpu.memory_space<vmem>>, vector<1x1x128xf32>
    %27 = vector.shape_cast %26 : vector<1x1x128xf32> to vector<1x128xf32>
    %28 = vector.broadcast %27 : vector<1x128xf32> to vector<64x128xf32>
    %29 = arith.addf %25, %28 : vector<64x128xf32>
    %cst_22 = arith.constant 0.000000e+00 : f32
    %30 = vector.broadcast %cst_22 : f32 to vector<64x128xf32>
    %31 = arith.maximumf %29, %30 : vector<64x128xf32>
    %32 = arith.truncf %31 : vector<64x128xf32> to vector<64x128xbf16>
    %33 = vector.shape_cast %32 : vector<64x128xbf16> to vector<8x8x128xbf16>
    %c0_23 = arith.constant 0 : index
    %c0_24 = arith.constant 0 : index
    %34 = vector.load %arg10[%c0_23, %c0_24] : memref<8x128xf32, #tpu.memory_space<vmem>>, vector<8x128xf32>
    %35 = arith.extf %33 : vector<8x8x128xbf16> to vector<8x8x128xf32>
    %cst_25 = arith.constant dense<0.000000e+00> : vector<8x128xf32>
    %36 = vector.multi_reduction <add>, %35, %cst_25 [1] : vector<8x8x128xf32> to vector<8x128xf32>
    %37 = arith.addf %34, %36 : vector<8x128xf32>
    %c0_26 = arith.constant 0 : index
    %c0_27 = arith.constant 0 : index
    %38 = vector.load %arg10[%c0_26, %c0_27] : memref<8x128xf32, #tpu.memory_space<vmem>>, vector<8x128xf32>
    tpu.vector_store %arg10[%c0_26, %c0_27], %37 {strides = array<i32>} : memref<8x128xf32, #tpu.memory_space<vmem>>, vector<8x128xf32>,
    %c0_i32_28 = arith.constant 0 : i32
    %39 = arith.cmpi eq, %arg1, %c0_i32_28 : i32
    %40 = arith.extui %39 : i1 to i32
    %c0_i32_29 = arith.constant 0 : i32
    %41 = arith.cmpi ne, %40, %c0_i32_29 : i32
    scf.if %41 {
      %c0_30 = arith.constant 0 : index
      %c0_31 = arith.constant 0 : index
      %42 = vector.load %arg10[%c0_30, %c0_31] : memref<8x128xf32, #tpu.memory_space<vmem>>, vector<8x128xf32>
      %cst_32 = arith.constant 1.250000e-01 : f32
      %43 = vector.broadcast %cst_32 : f32 to vector<8x128xf32>
      %44 = arith.mulf %42, %43 : vector<8x128xf32>
      %45 = arith.truncf %44 : vector<8x128xf32> to vector<8x128xbf16>
      %c0_33 = arith.constant 0 : index
      %c0_34 = arith.constant 0 : index
      %46 = vector.load %arg7[%c0_33, %c0_34] : memref<128x128xbf16, #tpu.memory_space<vmem>>, vector<128x128xbf16>
      %cst_35 = arith.constant dense<0.000000e+00> : vector<8x128xf32>
      %47 = tpu.matmul %45, %46, %cst_35 {dimension_numbers = #tpu.dot_dimension_numbers<[1], [0], [0], [1], [0, 0, 1, 1], [], []>} : vector<8x128xbf16>, vector<128x128xbf16>, vector<8x128xf32> -> vector<8x128xf32>
      %c0_36 = arith.constant 0 : index
      %c0_37 = arith.constant 0 : index
      %48 = vector.load %arg8[%c0_36, %c0_37] : memref<1x128xf32, #tpu.memory_space<vmem>>, vector<1x128xf32>
      %49 = vector.broadcast %48 : vector<1x128xf32> to vector<8x128xf32>
      %50 = arith.addf %47, %49 : vector<8x128xf32>
      %cst_38 = arith.constant dense<0xFF800000> : vector<8xf32>
      %51 = vector.multi_reduction <maximumf>, %50, %cst_38 [1] : vector<8x128xf32> to vector<8xf32>
      %52 = vector.shape_cast %51 : vector<8xf32> to vector<8x1xf32>
      %53 = vector.broadcast %52 : vector<8x1xf32> to vector<8x128xf32>
      %54 = arith.subf %50, %53 : vector<8x128xf32>
      %55 = math.exp %54 : vector<8x128xf32>
      %cst_39 = arith.constant dense<0.000000e+00> : vector<8xf32>
      %56 = vector.multi_reduction <add>, %55, %cst_39 [1] : vector<8x128xf32> to vector<8xf32>
      %57 = vector.shape_cast %56 : vector<8xf32> to vector<8x1xf32>
      %58 = vector.broadcast %57 : vector<8x1xf32> to vector<8x128xf32>
      %59 = arith.divf %55, %58 : vector<8x128xf32>
      %c0_40 = arith.constant 0 : index
      %c0_41 = arith.constant 0 : index
      %60 = vector.load %arg9[%c0_40, %c0_41] : memref<8x128xf32, #tpu.memory_space<vmem>>, vector<8x128xf32>
      tpu.vector_store %arg9[%c0_40, %c0_41], %59 {strides = array<i32>} : memref<8x128xf32, #tpu.memory_space<vmem>>, vector<8x128xf32>,
    } else {
    }
    return
  }
  func.func @transform_0(%arg0: i32, %arg1: i32) -> (i32, i32, i32) {
    %c0_i32 = arith.constant 0 : i32
    %c0_i32_0 = arith.constant 0 : i32
    return %arg0, %arg1, %c0_i32 : i32, i32, i32
  }
  func.func @transform_1(%arg0: i32, %arg1: i32) -> (i32, i32) {
    %c0_i32 = arith.constant 0 : i32
    %c0_i32_0 = arith.constant 0 : i32
    %c0_i32_1 = arith.constant 0 : i32
    return %c0_i32, %c0_i32_0 : i32, i32
  }
  func.func @transform_2(%arg0: i32, %arg1: i32) -> (i32, i32) {
    %c0_i32 = arith.constant 0 : i32
    %c0_i32_0 = arith.constant 0 : i32
    %c0_i32_1 = arith.constant 0 : i32
    return %c0_i32, %c0_i32_0 : i32, i32
  }
  func.func @transform_3(%arg0: i32, %arg1: i32) -> (i32, i32, i32) {
    %c0_i32 = arith.constant 0 : i32
    %c0_i32_0 = arith.constant 0 : i32
    %c0_i32_1 = arith.constant 0 : i32
    %c0_i32_2 = arith.constant 0 : i32
    return %c0_i32, %c0_i32_0, %c0_i32_1 : i32, i32, i32
  }
  func.func @transform_4(%arg0: i32, %arg1: i32) -> (i32, i32, i32) {
    %c0_i32 = arith.constant 0 : i32
    %c0_i32_0 = arith.constant 0 : i32
    %c0_i32_1 = arith.constant 0 : i32
    %c0_i32_2 = arith.constant 0 : i32
    return %c0_i32, %c0_i32_0, %c0_i32_1 : i32, i32, i32
  }
  func.func @transform_5(%arg0: i32, %arg1: i32) -> (i32, i32) {
    %c0_i32 = arith.constant 0 : i32
    %c0_i32_0 = arith.constant 0 : i32
    %c0_i32_1 = arith.constant 0 : i32
    return %c0_i32, %c0_i32_0 : i32, i32
  }
  func.func @transform_6(%arg0: i32, %arg1: i32) -> (i32, i32) {
    %c0_i32 = arith.constant 0 : i32
    %c0_i32_0 = arith.constant 0 : i32
    %c0_i32_1 = arith.constant 0 : i32
    return %c0_i32, %c0_i32_0 : i32, i32
  }
  func.func @transform_7(%arg0: i32, %arg1: i32) -> (i32, i32) {
    %c0_i32 = arith.constant 0 : i32
    %c0_i32_0 = arith.constant 0 : i32
    return %arg0, %c0_i32 : i32, i32
  }
}

</mosaic_0001>

<bundles_post_ra>
// kernel: annnet_forward.1
= control target key start
LH: loop header
LB: loop body
LE: loop exit
PB: predicated region body
PF: predicated region fallthrough
CT: control target
= control target key end

     0   :  { %vm75_vm0 = vcmask 130048   ;;  %vm926_vm1 = vmmov 0   ;;  %vm556_vm2 = vcmask 1041409   ;;  %vm558_vm3 = vcmask 1042434   ;;  %s1073_s1 = inlined_call_operand.vmem [shape: bf16[16,128], index: 1, kind: input, shape index: {}]   ;;  %s1074_s0 = inlined_call_operand.vmem [shape: bf16[8,8,16], index: 0, kind: input, shape index: {}]   ;;  %s1075_s3 = inlined_call_operand.vmem [shape: bf16[2,128,128], index: 3, kind: input, shape index: {}]   ;;  %s1076_s2 = inlined_call_operand.vmem [shape: f32[1,128], index: 2, kind: input, shape index: {}]   ;;  %s1077_s4 = inlined_call_operand.vmem [shape: f32[2,1,128], index: 4, kind: input, shape index: {}]   ;;  %s1078_s5 = inlined_call_operand.vmem [shape: bf16[128,128], index: 5, kind: input, shape index: {}]   ;;  %s1079_s6 = inlined_call_operand.vmem [shape: f32[1,128], index: 6, kind: input, shape index: {}]   ;;  %s1080_s7 = inlined_call_operand.vmem [shape: f32[8,128], index: 7, kind: output, shape index: {}]  }
   0x1   :  { %v892_v0 = vld [vmem:[%s1073_s1] sm:$0xff]   ;;  %v894_v2 = vld [vmem:[%s1074_s0 + $0x8] sm:$0xff]   ;;  %v895_v3 = vld [vmem:[%s1074_s0 + $0x10] sm:$0xff]   ;;  %vm560_vm4 = vcmask 1043459   ;;  %vm562_vm5 = vcmask 1044484   ;;  %vm564_vm6 = vcmask 1045509  }
   0x2   :  { %v893_v1 = vld [vmem:[%s1074_s0] sm:$0xff]   ;;  %812 = vmatprep.subr.bf16.mxu0 %v892_v0  ;;  %v898_v5 = vld [vmem:[%s1075_s3 + $0x8] sm:$0xff]   ;;  %v899_v6 = vld [vmem:[%s1075_s3 + $0x10] sm:$0xff]   ;;  %vm566_vm7 = vcmask 1046534   ;;  %vm568_vm8 = vcmask 1047559  }
   0x3   :  { %813 = vmatpush3.bf16.msra.mxu0 %v892_v0  ;;  %814 = vmatprep.mubr.msk.bf16.mxu0 %vm75_vm0, %v893_v1  ;;  %v897_v4 = vld [vmem:[%s1075_s3] sm:$0xff]   ;;  %v896_v7 = vld [vmem:[%s1074_s0 + $0x18] sm:$0xff]   ;;  %v902_v10 = vld [vmem:[%s1075_s3 + $0x28] sm:$0xff]  }
   0x4   :  { %822 = vmatprep.subr.bf16.mxu1 %v897_v4  ;;  %v900_v8 = vld [vmem:[%s1075_s3 + $0x18] sm:$0xff]   ;;  %v901_v9 = vld [vmem:[%s1075_s3 + $0x20] sm:$0xff]   ;;  %v903_v11 = vld [vmem:[%s1075_s3 + $0x30] sm:$0xff]  }
   0x5   :  { %823 = vmatpush3.bf16.msra.mxu1 %v897_v4  ;;  %v904_v12 = vld [vmem:[%s1075_s3 + $0x38] sm:$0xff]   ;;  %v905_v13 = vld [vmem:[%s1075_s3 + $0x40] sm:$0xff]   ;;  %v906_v14 = vld [vmem:[%s1075_s3 + $0x48] sm:$0xff]  }
   0x6   :  { %815 = vmatmul.mubr.msk.bf16.vlgmr.msra.gmra.mrb[0].mxu0 %vm75_vm0, %v894_v2  ;;  %824 = vmatprep.subr.bf16.mxu1 %v898_v5  ;;  %v907_v15 = vld [vmem:[%s1075_s3 + $0x50] sm:$0xff]   ;;  %v908_v16 = vld [vmem:[%s1075_s3 + $0x58] sm:$0xff]   ;;  %v909_v17 = vld [vmem:[%s1075_s3 + $0x60] sm:$0xff]  }
   0x7   :  { %818 = vmatprep.mubr.msk.bf16.mxu0 %vm75_vm0, %v895_v3  ;;  %846 = vmatprep.subr.bf16.mxu0 %v905_v13  ;;  %v910_v18 = vld [vmem:[%s1075_s3 + $0x68] sm:$0xff]   ;;  %v704_v19 = vld [vmem:[%s1076_s2] ss:$0 sm:$0xff]  ;;  %v911_v48 = vld [vmem:[%s1075_s3 + $0x70] sm:$0xff]  }
   0x8   :  { %847 = vmatpush3.bf16.msra.mxu0 %v905_v13  ;;  %v912_v49 = vld [vmem:[%s1075_s3 + $0x78] sm:$0xff]   ;;  %v714_v50 = vld [vmem:[%s1077_s4] ss:$0 sm:$0xff] }
   0x9   :  { %825 = vmatpush3.bf16.msra.mxu1 %v898_v5  ;;  %848 = vmatprep.subr.bf16.mxu0 %v906_v14 }
   0xa   :  { %826 = vmatprep.subr.bf16.mxu1 %v899_v6 }
   0xc   :  { %849 = vmatpush3.bf16.msra.mxu0 %v906_v14 }
   0xd   :  { %827 = vmatpush3.bf16.msra.mxu1 %v899_v6  ;;  %850 = vmatprep.subr.bf16.mxu0 %v907_v15 }
   0xe   :  { %819 = vmatmul.mubr.msk.bf16.gmra.mrb[4].mxu0 %vm75_vm0, %v896_v7  ;;  %828 = vmatprep.subr.bf16.mxu1 %v900_v8 }
  0x10   :  { %851 = vmatpush3.bf16.msra.mxu0 %v907_v15  ;;  %v913_v15 = vld [vmem:[%s1078_s5] sm:$0xff]  }
  0x11   :  { %829 = vmatpush3.bf16.msra.mxu1 %v900_v8  ;;  %852 = vmatprep.subr.bf16.mxu0 %v908_v16 }
  0x12   :  { %830 = vmatprep.subr.bf16.mxu1 %v901_v9 }
  0x14   :  { %853 = vmatpush3.bf16.msra.mxu0 %v908_v16  ;;  %v925_v16 = vmov 0.0  }
  0x15   :  { %831 = vmatpush3.bf16.msra.mxu1 %v901_v9  ;;  %854 = vmatprep.subr.bf16.mxu0 %v909_v17 }
  0x16   :  { %832 = vmatprep.subr.bf16.mxu1 %v902_v10 }
  0x18   :  { %855 = vmatpush3.bf16.msra.mxu0 %v909_v17  ;;  %v914_v17 = vld [vmem:[%s1078_s5 + $0x8] sm:$0xff]  }
  0x19   :  { %833 = vmatpush3.bf16.msra.mxu1 %v902_v10  ;;  %856 = vmatprep.subr.bf16.mxu0 %v910_v18 }
  0x1a   :  { %834 = vmatprep.subr.bf16.mxu1 %v903_v11 }
  0x1c   :  { %857 = vmatpush3.bf16.msra.mxu0 %v910_v18  ;;  %v915_v18 = vld [vmem:[%s1078_s5 + $0x10] sm:$0xff]  }
  0x1d   :  { %835 = vmatpush3.bf16.msra.mxu1 %v903_v11  ;;  %858 = vmatprep.subr.bf16.mxu0 %v911_v48 }
  0x1e   :  { %836 = vmatprep.subr.bf16.mxu1 %v904_v12 }
  0x20   :  { %859 = vmatpush3.bf16.msra.mxu0 %v911_v48 }
  0x21   :  { %837 = vmatpush3.bf16.msra.mxu1 %v904_v12  ;;  %860 = vmatprep.subr.bf16.mxu0 %v912_v49 }
  0x22   :  { %870 = vmatprep.subr.bf16.mxu1 %v925_v16 }
  0x24   :  { %861 = vmatpush3.bf16.msra.mxu0 %v912_v49 }
  0xd9   :  { %v816_v20 = vpop.f32.mrb[0].mxu0 }
  0xda   :  { %v131_v21 = vadd.f32 %v816_v20, %v704_v19  ;;  %v122_v22 = vpop.f32.mrb[1].mxu0  ;;  %v917_v20 = vld [vmem:[%s1078_s5 + $0x20] sm:$0xff]  }
  0xdb   :  { %v123_v23 = vadd.f32 %v704_v19, %v122_v22  ;;  %v817_v24 = vpop.f32.mrb[2].mxu0  ;;  %v919_v22 = vld [vmem:[%s1078_s5 + $0x30] sm:$0xff]  }
  0xdc   :  { %v134_v25 = vadd.f32 %v817_v24, %v704_v19  ;;  %v125_v26 = vpop.f32.mrb[3].mxu0  ;;  %v155_v28 = vmax.f32 %v131_v21, 0.0  ;;  %v918_v21 = vld [vmem:[%s1078_s5 + $0x28] sm:$0xff]   ;;  %v740_v24 = vld [vmem:[%s1077_s4 + $0x1] ss:$0 sm:$0xff] }
  0xdd   :  { %v126_v27 = vadd.f32 %v704_v19, %v125_v26  ;;  %v153_v30 = vmax.f32 %v123_v23, 0.0  ;;  %v920_v23 = vld [vmem:[%s1078_s5 + $0x38] sm:$0xff]  }
  0xde   :  { %v156_v29 = vmax.f32 %v134_v25, 0.0 }
  0xdf   :  { %v154_v31 = vmax.f32 %v126_v27, 0.0 }
  0xe0   :  { %v162_v32 = vpack.c.bf16 %v156_v29, %v155_v28 }
  0xe1   :  { %v820_v33 = vpop.f32.mrb[4].mxu0  ;;  %v161_v34 = vpack.c.bf16 %v154_v31, %v153_v30 }
  0xe2   :  { %v147_v35 = vadd.f32 %v820_v33, %v704_v19  ;;  %v138_v36 = vpop.f32.mrb[5].mxu0 }
  0xe3   :  { %v139_v37 = vadd.f32 %v704_v19, %v138_v36  ;;  %v821_v38 = vpop.f32.mrb[6].mxu0  ;;  %838 = vmatprep.mubr.bf16.mxu1 %v161_v34 }
  0xe4   :  { %v150_v39 = vadd.f32 %v821_v38, %v704_v19  ;;  %v141_v40 = vpop.f32.mrb[7].mxu0  ;;  %839 = vmatmul.mubr.bf16.vlgmr.msra.gmra.mrb[0].mxu1 %v162_v32  ;;  %v159_v42 = vmax.f32 %v147_v35, 0.0 }
  0xe5   :  { %v142_v41 = vadd.f32 %v704_v19, %v141_v40  ;;  %v157_v44 = vmax.f32 %v139_v37, 0.0  ;;  %871 = vmatpush3.bf16.msra.mxu1 %v913_v15  ;;  %v916_v19 = vld [vmem:[%s1078_s5 + $0x18] sm:$0xff]  }
  0xe6   :  { %v160_v43 = vmax.f32 %v150_v39, 0.0  ;;  %872 = vmatprep.subr.bf16.mxu1 %v925_v16 }
  0xe7   :  { %v158_v45 = vmax.f32 %v142_v41, 0.0 }
  0xe8   :  { %v164_v46 = vpack.c.bf16 %v160_v43, %v159_v42 }
  0xe9   :  { %v163_v47 = vpack.c.bf16 %v158_v45, %v157_v44  ;;  %873 = vmatpush3.bf16.msra.mxu1 %v914_v17 }
  0xea   :  { %874 = vmatprep.subr.bf16.mxu1 %v925_v16 }
  0xeb   :  { %842 = vmatprep.mubr.bf16.mxu1 %v163_v47 }
  0xec   :  { %843 = vmatmul.mubr.bf16.gmra.mrb[4].mxu1 %v164_v46 }
  0xed   :  { %875 = vmatpush3.bf16.msra.mxu1 %v915_v18  ;;  %886 = vmatprep.mubr.msk.bf16.mxu1 %vm926_vm1, %v925_v16 }
  0xee   :  { %876 = vmatprep.subr.bf16.mxu1 %v925_v16 }
  0xf1   :  { %877 = vmatpush3.bf16.msra.mxu1 %v916_v19 }
  0xf2   :  { %878 = vmatprep.subr.bf16.mxu1 %v925_v16 }
  0xf5   :  { %879 = vmatpush3.bf16.msra.mxu1 %v917_v20 }
  0xf6   :  { %880 = vmatprep.subr.bf16.mxu1 %v925_v16 }
  0xf9   :  { %881 = vmatpush3.bf16.msra.mxu1 %v918_v21 }
  0xfa   :  { %882 = vmatprep.subr.bf16.mxu1 %v925_v16 }
  0xfd   :  { %883 = vmatpush3.bf16.msra.mxu1 %v919_v22 }
  0xfe   :  { %884 = vmatprep.subr.bf16.mxu1 %v925_v16 }
 0x101   :  { %885 = vmatpush3.bf16.msra.mxu1 %v920_v23 }
 0x1b7   :  { %v840_v51 = vpop.f32.mrb[0].mxu1 }
 0x1b8   :  { %v279_v52 = vadd.f32 %v840_v51, %v714_v50  ;;  %v270_v53 = vpop.f32.mrb[1].mxu1 }
 0x1b9   :  { %v271_v54 = vadd.f32 %v714_v50, %v270_v53  ;;  %v841_v55 = vpop.f32.mrb[2].mxu1 }
 0x1ba   :  { %v282_v56 = vadd.f32 %v841_v55, %v714_v50  ;;  %v273_v57 = vpop.f32.mrb[3].mxu1  ;;  %v303_v59 = vmax.f32 %v279_v52, 0.0 }
 0x1bb   :  { %v274_v58 = vadd.f32 %v714_v50, %v273_v57  ;;  %v301_v61 = vmax.f32 %v271_v54, 0.0 }
 0x1bc   :  { %v304_v60 = vmax.f32 %v282_v56, 0.0 }
 0x1bd   :  { %v302_v62 = vmax.f32 %v274_v58, 0.0 }
 0x1be   :  { %v310_v63 = vpack.c.bf16 %v304_v60, %v303_v59 }
 0x1bf   :  { %v309_v0 = vpack.c.bf16 %v302_v62, %v301_v61  ;;  %v844_v1 = vpop.f32.mrb[4].mxu1 }
 0x1c0   :  { %v295_v2 = vadd.f32 %v844_v1, %v714_v50  ;;  %v286_v3 = vpop.f32.mrb[5].mxu1 }
 0x1c1   :  { %v287_v4 = vadd.f32 %v714_v50, %v286_v3  ;;  %v845_v5 = vpop.f32.mrb[6].mxu1  ;;  %862 = vmatprep.mubr.bf16.mxu0 %v309_v0 }
 0x1c2   :  { %v298_v6 = vadd.f32 %v845_v5, %v714_v50  ;;  %v289_v7 = vpop.f32.mrb[7].mxu1  ;;  %863 = vmatmul.mubr.bf16.vlgmr.msra.gmra.mrb[8].mxu0 %v310_v63  ;;  %v307_v9 = vmax.f32 %v295_v2, 0.0 }
 0x1c3   :  { %v290_v8 = vadd.f32 %v714_v50, %v289_v7  ;;  %v305_v11 = vmax.f32 %v287_v4, 0.0 }
 0x1c4   :  { %v308_v10 = vmax.f32 %v298_v6, 0.0 }
 0x1c5   :  { %v306_v12 = vmax.f32 %v290_v8, 0.0 }
 0x1c6   :  { %v312_v13 = vpack.c.bf16 %v308_v10, %v307_v9 }
 0x1c7   :  { %v311_v14 = vpack.c.bf16 %v306_v12, %v305_v11 }
 0x1c9   :  { %866 = vmatprep.mubr.bf16.mxu0 %v311_v14 }
 0x1ca   :  { %867 = vmatmul.mubr.bf16.gmra.mrb[12].mxu0 %v312_v13 }
 0x295   :  { %v864_v25 = vpop.f32.mrb[8].mxu0 }
 0x296   :  { %v429_v26 = vadd.f32 %v864_v25, %v740_v24  ;;  %v420_v27 = vpop.f32.mrb[9].mxu0 }
 0x297   :  { %v421_v28 = vadd.f32 %v740_v24, %v420_v27  ;;  %v865_v29 = vpop.f32.mrb[10].mxu0 }
 0x298   :  { %v453_v30 = vmax.f32 %v429_v26, 0.0  ;;  %v432_v31 = vadd.f32 %v865_v29, %v740_v24  ;;  %v423_v32 = vpop.f32.mrb[11].mxu0 }
 0x299   :  { %v451_v33 = vmax.f32 %v421_v28, 0.0  ;;  %v424_v34 = vadd.f32 %v740_v24, %v423_v32 }
 0x29a   :  { %v768_v35 = vpack.c.bf16 %v453_v30, %v453_v30  ;;  %v454_v36 = vmax.f32 %v432_v31, 0.0 }
 0x29b   :  { %v766_v37 = vpack.c.bf16 %v451_v33, %v451_v33  ;;  %v452_v38 = vmax.f32 %v424_v34, 0.0 }
 0x29c   :  { %v494_v39 = vunpack.c.l.bf16 %v768_v35  ;;  %v769_v40 = vpack.c.bf16 %v454_v36, %v454_v36 }
 0x29d   :  { %v492_v41 = vunpack.c.l.bf16 %v766_v37  ;;  %v767_v42 = vpack.c.bf16 %v452_v38, %v452_v38  ;;  %v868_v43 = vpop.f32.mrb[12].mxu0 }
 0x29e   :  { %v512_v44 = vrot.slane %v494_v39, 4  ;;  %v495_v45 = vunpack.c.l.bf16 %v769_v40  ;;  %v445_v46 = vadd.f32 %v868_v43, %v740_v24  ;;  %v436_v47 = vpop.f32.mrb[13].mxu0 }
 0x29f   :  { %v500_v48 = vrot.slane %v492_v41, 4  ;;  %v493_v49 = vunpack.c.l.bf16 %v767_v42  ;;  %v437_v50 = vadd.f32 %v740_v24, %v436_v47  ;;  %v869_v51 = vpop.f32.mrb[14].mxu0 }
 0x2a0   :  { %v513_v52 = vadd.f32 %v512_v44, %v494_v39  ;;  %v518_v53 = vrot.slane %v495_v45, 4  ;;  %v457_v54 = vmax.f32 %v445_v46, 0.0  ;;  %v448_v55 = vadd.f32 %v869_v51, %v740_v24  ;;  %v439_v56 = vpop.f32.mrb[15].mxu0 }
 0x2a1   :  { %v501_v57 = vadd.f32 %v500_v48, %v492_v41  ;;  %v506_v58 = vrot.slane %v493_v49, 4  ;;  %v455_v59 = vmax.f32 %v437_v50, 0.0  ;;  %v440_v60 = vadd.f32 %v740_v24, %v439_v56 }
 0x2a2   :  { %v514_v61 = vrot.slane %v513_v52, 2  ;;  %v519_v62 = vadd.f32 %v518_v53, %v495_v45  ;;  %v772_v63 = vpack.c.bf16 %v457_v54, %v457_v54  ;;  %v458_v0 = vmax.f32 %v448_v55, 0.0 }
 0x2a3   :  { %v502_v1 = vrot.slane %v501_v57, 2  ;;  %v507_v2 = vadd.f32 %v506_v58, %v493_v49  ;;  %v770_v3 = vpack.c.bf16 %v455_v59, %v455_v59  ;;  %v456_v4 = vmax.f32 %v440_v60, 0.0  ;;  %v757_v58 = vld [vmem:[%s1079_s6] ss:$0 sm:$0xff] }
 0x2a4   :  { %v515_v5 = vadd.f32 %v514_v61, %v513_v52  ;;  %v520_v6 = vrot.slane %v519_v62, 2  ;;  %v498_v7 = vunpack.c.l.bf16 %v772_v63  ;;  %v773_v8 = vpack.c.bf16 %v458_v0, %v458_v0 }
 0x2a5   :  { %v503_v9 = vadd.f32 %v502_v1, %v501_v57  ;;  %v508_v10 = vrot.slane %v507_v2, 2  ;;  %v496_v11 = vunpack.c.l.bf16 %v770_v3  ;;  %v771_v12 = vpack.c.bf16 %v456_v4, %v456_v4 }
 0x2a6   :  { %v521_v13 = vadd.f32 %v520_v6, %v519_v62  ;;  %v536_v14 = vrot.slane %v498_v7, 4  ;;  %v499_v15 = vunpack.c.l.bf16 %v773_v8  ;;  %v516_v20 = vrot.slane %v515_v5, 1 }
 0x2a7   :  { %v504_v16 = vrot.slane %v503_v9, 1  ;;  %v509_v17 = vadd.f32 %v508_v10, %v507_v2  ;;  %v524_v18 = vrot.slane %v496_v11, 4  ;;  %v497_v19 = vunpack.c.l.bf16 %v771_v12 }
 0x2a8   :  { %v537_v21 = vadd.f32 %v536_v14, %v498_v7  ;;  %v542_v22 = vrot.slane %v499_v15, 4  ;;  %v522_v23 = vrot.slane %v521_v13, 1  ;;  %v517_v33 = vadd.f32 %v516_v20, %v515_v5 }
 0x2a9   :  { %v510_v24 = vrot.slane %v509_v17, 1  ;;  %v525_v25 = vadd.f32 %v524_v18, %v496_v11  ;;  %v530_v26 = vrot.slane %v497_v19, 4  ;;  %v505_v29 = vadd.f32 %v504_v16, %v503_v9 }
 0x2aa   :  { %v538_v27 = vrot.slane %v537_v21, 2  ;;  %v543_v28 = vadd.f32 %v542_v22, %v499_v15  ;;  %v523_v36 = vadd.f32 %v522_v23, %v521_v13 }
 0x2ab   :  { %v511_v30 = vadd.f32 %v510_v24, %v509_v17  ;;  %v526_v31 = vrot.slane %v525_v25, 2  ;;  %v531_v32 = vadd.f32 %v530_v26, %v497_v19 }
 0x2ac   :  { %v539_v34 = vadd.f32 %v538_v27, %v537_v21  ;;  %v544_v35 = vrot.slane %v543_v28, 2 }
 0x2ad   :  { %v557_v37 = vsel %vm556_vm2, %v511_v30, %v505_v29  ;;  %v527_v38 = vadd.f32 %v526_v31, %v525_v25  ;;  %v532_v39 = vrot.slane %v531_v32, 2 }
 0x2ae   :  { %v559_v40 = vsel %vm558_vm3, %v517_v33, %v557_v37  ;;  %v545_v41 = vadd.f32 %v544_v35, %v543_v28  ;;  %v540_v45 = vrot.slane %v539_v34, 1 }
 0x2af   :  { %v528_v42 = vrot.slane %v527_v38, 1  ;;  %v561_v43 = vsel %vm560_vm4, %v523_v36, %v559_v40  ;;  %v533_v44 = vadd.f32 %v532_v39, %v531_v32 }
 0x2b0   :  { %v546_v47 = vrot.slane %v545_v41, 1  ;;  %v541_v51 = vadd.f32 %v540_v45, %v539_v34 }
 0x2b1   :  { %v529_v46 = vadd.f32 %v528_v42, %v527_v38  ;;  %v534_v48 = vrot.slane %v533_v44, 1 }
 0x2b2   :  { %v547_v52 = vadd.f32 %v546_v47, %v545_v41 }
 0x2b3   :  { %v563_v49 = vsel %vm562_vm5, %v529_v46, %v561_v43  ;;  %v535_v50 = vadd.f32 %v534_v48, %v533_v44 }
 0x2b5   :  { %v565_v53 = vsel %vm564_vm6, %v535_v50, %v563_v49 }
 0x2b6   :  { %v567_v54 = vsel %vm566_vm7, %v541_v51, %v565_v53 }
 0x2b7   :  { %v569_v55 = vsel %vm568_vm8, %v547_v52, %v567_v54 }
 0x2b8   :  { %v577_v56 = vmul.f32 0.125, %v569_v55 }
 0x2ba   :  { %v578_v57 = vpack.c.bf16 %v577_v56, %v577_v56 }
 0x2bc   :  { %887 = vmatmul.mubr.bf16.vlgmr.msra.gmra.mrb[8].mxu1 %v578_v57 }
 0x38f   :  { %v684_v59 = vpop.f32.mrb[8].mxu1 }
 0x390   :  { %v685_v60 = vadd.f32 %v757_v58, %v684_v59  ;;  %v888_v61 = vpop.f32.mrb[9].mxu1 }
 0x391   :  { %v687_v62 = vpop.f32.mrb[10].mxu1 }
 0x392   :  { %690 = vmax.xlane.f32.xlu0 %v685_v60  ;;  %v889_v63 = vpop.f32.mrb[11].mxu1 }
 0x41f   :  { %v691_v0 = vpop.xlane.xlu0 %690 }
 0x420   :  { %v692_v1 = vsub.f32 %v685_v60, %v691_v0 }
 0x422   :  { %v693_v2 = vmul.f32 1.442695, %v692_v1 }
 0x424   :  { %921 = vpow2.f32 %v693_v2 }
 0x42e   :  { %v922_v3 = vpop.eup %921 }
 0x42f   :  { %695 = vadd.xlane.f32.xlu0 %v922_v3 }
 0x4bc   :  { %v696_v4 = vpop.xlane.xlu0 %695 }
 0x4bd   :  { %923 = vrcp.f32 %v696_v4 }
 0x4c7   :  { %v924_v5 = vpop.eup %923 }
 0x4c8   :  { %v698_v6 = vmul.f32 %v924_v5, %v922_v3 }
 0x4ca   :  { %699 = vst [vmem:[%s1080_s7] sm:$0xff] %v698_v6 }

// kernel: annnet_forward.1
= control target key start
LH: loop header
LB: loop body
LE: loop exit
PB: predicated region body
PF: predicated region fallthrough
CT: control target
= control target key end

     0   :  { %vm75_vm0 = vcmask 130048   ;;  %vm926_vm1 = vmmov 0   ;;  %vm556_vm2 = vcmask 1041409   ;;  %vm558_vm3 = vcmask 1042434   ;;  %s1073_s1 = inlined_call_operand.vmem [shape: bf16[16,128], index: 1, kind: input, shape index: {}]   ;;  %s1074_s0 = inlined_call_operand.vmem [shape: bf16[8,8,16], index: 0, kind: input, shape index: {}]   ;;  %s1075_s3 = inlined_call_operand.vmem [shape: bf16[2,128,128], index: 3, kind: input, shape index: {}]   ;;  %s1076_s2 = inlined_call_operand.vmem [shape: f32[1,128], index: 2, kind: input, shape index: {}]   ;;  %s1077_s4 = inlined_call_operand.vmem [shape: f32[2,1,128], index: 4, kind: input, shape index: {}]   ;;  %s1078_s5 = inlined_call_operand.vmem [shape: bf16[128,128], index: 5, kind: input, shape index: {}]   ;;  %s1079_s6 = inlined_call_operand.vmem [shape: f32[1,128], index: 6, kind: input, shape index: {}]   ;;  %s1080_s7 = inlined_call_operand.vmem [shape: f32[8,128], index: 7, kind: output, shape index: {}]  }
   0x1   :  { %v892_v0 = vld [vmem:[%s1073_s1] sm:$0xff]   ;;  %v894_v2 = vld [vmem:[%s1074_s0 + $0x8] sm:$0xff]   ;;  %v895_v3 = vld [vmem:[%s1074_s0 + $0x10] sm:$0xff]   ;;  %vm560_vm4 = vcmask 1043459   ;;  %vm562_vm5 = vcmask 1044484   ;;  %vm564_vm6 = vcmask 1045509  }
   0x2   :  { %v893_v1 = vld [vmem:[%s1074_s0] sm:$0xff]   ;;  %812 = vmatprep.subr.bf16.mxu0 %v892_v0  ;;  %v898_v5 = vld [vmem:[%s1075_s3 + $0x8] sm:$0xff]   ;;  %v899_v6 = vld [vmem:[%s1075_s3 + $0x10] sm:$0xff]   ;;  %vm566_vm7 = vcmask 1046534   ;;  %vm568_vm8 = vcmask 1047559  }
   0x3   :  { %813 = vmatpush3.bf16.msra.mxu0 %v892_v0  ;;  %814 = vmatprep.mubr.msk.bf16.mxu0 %vm75_vm0, %v893_v1  ;;  %v897_v4 = vld [vmem:[%s1075_s3] sm:$0xff]   ;;  %v896_v7 = vld [vmem:[%s1074_s0 + $0x18] sm:$0xff]   ;;  %v902_v10 = vld [vmem:[%s1075_s3 + $0x28] sm:$0xff]  }
   0x4   :  { %822 = vmatprep.subr.bf16.mxu1 %v897_v4  ;;  %v900_v8 = vld [vmem:[%s1075_s3 + $0x18] sm:$0xff]   ;;  %v901_v9 = vld [vmem:[%s1075_s3 + $0x20] sm:$0xff]   ;;  %v903_v11 = vld [vmem:[%s1075_s3 + $0x30] sm:$0xff]  }
   0x5   :  { %823 = vmatpush3.bf16.msra.mxu1 %v897_v4  ;;  %v904_v12 = vld [vmem:[%s1075_s3 + $0x38] sm:$0xff]   ;;  %v905_v13 = vld [vmem:[%s1075_s3 + $0x40] sm:$0xff]   ;;  %v906_v14 = vld [vmem:[%s1075_s3 + $0x48] sm:$0xff]  }
   0x6   :  { %815 = vmatmul.mubr.msk.bf16.vlgmr.msra.gmra.mrb[0].mxu0 %vm75_vm0, %v894_v2  ;;  %824 = vmatprep.subr.bf16.mxu1 %v898_v5  ;;  %v907_v15 = vld [vmem:[%s1075_s3 + $0x50] sm:$0xff]   ;;  %v908_v16 = vld [vmem:[%s1075_s3 + $0x58] sm:$0xff]   ;;  %v909_v17 = vld [vmem:[%s1075_s3 + $0x60] sm:$0xff]  }
   0x7   :  { %818 = vmatprep.mubr.msk.bf16.mxu0 %vm75_vm0, %v895_v3  ;;  %846 = vmatprep.subr.bf16.mxu0 %v905_v13  ;;  %v910_v18 = vld [vmem:[%s1075_s3 + $0x68] sm:$0xff]   ;;  %v704_v19 = vld [vmem:[%s1076_s2] ss:$0 sm:$0xff]  ;;  %v911_v48 = vld [vmem:[%s1075_s3 + $0x70] sm:$0xff]  }
   0x8   :  { %847 = vmatpush3.bf16.msra.mxu0 %v905_v13  ;;  %v912_v49 = vld [vmem:[%s1075_s3 + $0x78] sm:$0xff]   ;;  %v714_v50 = vld [vmem:[%s1077_s4] ss:$0 sm:$0xff] }
   0x9   :  { %825 = vmatpush3.bf16.msra.mxu1 %v898_v5  ;;  %848 = vmatprep.subr.bf16.mxu0 %v906_v14 }
   0xa   :  { %826 = vmatprep.subr.bf16.mxu1 %v899_v6 }
   0xc   :  { %849 = vmatpush3.bf16.msra.mxu0 %v906_v14 }
   0xd   :  { %827 = vmatpush3.bf16.msra.mxu1 %v899_v6  ;;  %850 = vmatprep.subr.bf16.mxu0 %v907_v15 }
   0xe   :  { %819 = vmatmul.mubr.msk.bf16.gmra.mrb[4].mxu0 %vm75_vm0, %v896_v7  ;;  %828 = vmatprep.subr.bf16.mxu1 %v900_v8 }
  0x10   :  { %851 = vmatpush3.bf16.msra.mxu0 %v907_v15  ;;  %v913_v15 = vld [vmem:[%s1078_s5] sm:$0xff]  }
  0x11   :  { %829 = vmatpush3.bf16.msra.mxu1 %v900_v8  ;;  %852 = vmatprep.subr.bf16.mxu0 %v908_v16 }
  0x12   :  { %830 = vmatprep.subr.bf16.mxu1 %v901_v9 }
  0x14   :  { %853 = vmatpush3.bf16.msra.mxu0 %v908_v16  ;;  %v925_v16 = vmov 0.0  }
  0x15   :  { %831 = vmatpush3.bf16.msra.mxu1 %v901_v9  ;;  %854 = vmatprep.subr.bf16.mxu0 %v909_v17 }
  0x16   :  { %832 = vmatprep.subr.bf16.mxu1 %v902_v10 }
  0x18   :  { %855 = vmatpush3.bf16.msra.mxu0 %v909_v17  ;;  %v914_v17 = vld [vmem:[%s1078_s5 + $0x8] sm:$0xff]  }
  0x19   :  { %833 = vmatpush3.bf16.msra.mxu1 %v902_v10  ;;  %856 = vmatprep.subr.bf16.mxu0 %v910_v18 }
  0x1a   :  { %834 = vmatprep.subr.bf16.mxu1 %v903_v11 }
  0x1c   :  { %857 = vmatpush3.bf16.msra.mxu0 %v910_v18  ;;  %v915_v18 = vld [vmem:[%s1078_s5 + $0x10] sm:$0xff]  }
  0x1d   :  { %835 = vmatpush3.bf16.msra.mxu1 %v903_v11  ;;  %858 = vmatprep.subr.bf16.mxu0 %v911_v48 }
  0x1e   :  { %836 = vmatprep.subr.bf16.mxu1 %v904_v12 }
  0x20   :  { %859 = vmatpush3.bf16.msra.mxu0 %v911_v48 }
  0x21   :  { %837 = vmatpush3.bf16.msra.mxu1 %v904_v12  ;;  %860 = vmatprep.subr.bf16.mxu0 %v912_v49 }
  0x22   :  { %870 = vmatprep.subr.bf16.mxu1 %v925_v16 }
  0x24   :  { %861 = vmatpush3.bf16.msra.mxu0 %v912_v49 }
  0xd9   :  { %v816_v20 = vpop.f32.mrb[0].mxu0 }
  0xda   :  { %v131_v21 = vadd.f32 %v816_v20, %v704_v19  ;;  %v122_v22 = vpop.f32.mrb[1].mxu0  ;;  %v917_v20 = vld [vmem:[%s1078_s5 + $0x20] sm:$0xff]  }
  0xdb   :  { %v123_v23 = vadd.f32 %v704_v19, %v122_v22  ;;  %v817_v24 = vpop.f32.mrb[2].mxu0  ;;  %v919_v22 = vld [vmem:[%s1078_s5 + $0x30] sm:$0xff]  }
  0xdc   :  { %v134_v25 = vadd.f32 %v817_v24, %v704_v19  ;;  %v125_v26 = vpop.f32.mrb[3].mxu0  ;;  %v155_v28 = vmax.f32 %v131_v21, 0.0  ;;  %v918_v21 = vld [vmem:[%s1078_s5 + $0x28] sm:$0xff]   ;;  %v740_v24 = vld [vmem:[%s1077_s4 + $0x1] ss:$0 sm:$0xff] }
  0xdd   :  { %v126_v27 = vadd.f32 %v704_v19, %v125_v26  ;;  %v153_v30 = vmax.f32 %v123_v23, 0.0  ;;  %v920_v23 = vld [vmem:[%s1078_s5 + $0x38] sm:$0xff]  }
  0xde   :  { %v156_v29 = vmax.f32 %v134_v25, 0.0 }
  0xdf   :  { %v154_v31 = vmax.f32 %v126_v27, 0.0 }
  0xe0   :  { %v162_v32 = vpack.c.bf16 %v156_v29, %v155_v28 }
  0xe1   :  { %v820_v33 = vpop.f32.mrb[4].mxu0  ;;  %v161_v34 = vpack.c.bf16 %v154_v31, %v153_v30 }
  0xe2   :  { %v147_v35 = vadd.f32 %v820_v33, %v704_v19  ;;  %v138_v36 = vpop.f32.mrb[5].mxu0 }
  0xe3   :  { %v139_v37 = vadd.f32 %v704_v19, %v138_v36  ;;  %v821_v38 = vpop.f32.mrb[6].mxu0  ;;  %838 = vmatprep.mubr.bf16.mxu1 %v161_v34 }
  0xe4   :  { %v150_v39 = vadd.f32 %v821_v38, %v704_v19  ;;  %v141_v40 = vpop.f32.mrb[7].mxu0  ;;  %839 = vmatmul.mubr.bf16.vlgmr.msra.gmra.mrb[0].mxu1 %v162_v32  ;;  %v159_v42 = vmax.f32 %v147_v35, 0.0 }
  0xe5   :  { %v142_v41 = vadd.f32 %v704_v19, %v141_v40  ;;  %v157_v44 = vmax.f32 %v139_v37, 0.0  ;;  %871 = vmatpush3.bf16.msra.mxu1 %v913_v15  ;;  %v916_v19 = vld [vmem:[%s1078_s5 + $0x18] sm:$0xff]  }
  0xe6   :  { %v160_v43 = vmax.f32 %v150_v39, 0.0  ;;  %872 = vmatprep.subr.bf16.mxu1 %v925_v16 }
  0xe7   :  { %v158_v45 = vmax.f32 %v142_v41, 0.0 }
  0xe8   :  { %v164_v46 = vpack.c.bf16 %v160_v43, %v159_v42 }
  0xe9   :  { %v163_v47 = vpack.c.bf16 %v158_v45, %v157_v44  ;;  %873 = vmatpush3.bf16.msra.mxu1 %v914_v17 }
  0xea   :  { %874 = vmatprep.subr.bf16.mxu1 %v925_v16 }
  0xeb   :  { %842 = vmatprep.mubr.bf16.mxu1 %v163_v47 }
  0xec   :  { %843 = vmatmul.mubr.bf16.gmra.mrb[4].mxu1 %v164_v46 }
  0xed   :  { %875 = vmatpush3.bf16.msra.mxu1 %v915_v18  ;;  %886 = vmatprep.mubr.msk.bf16.mxu1 %vm926_vm1, %v925_v16 }
  0xee   :  { %876 = vmatprep.subr.bf16.mxu1 %v925_v16 }
  0xf1   :  { %877 = vmatpush3.bf16.msra.mxu1 %v916_v19 }
  0xf2   :  { %878 = vmatprep.subr.bf16.mxu1 %v925_v16 }
  0xf5   :  { %879 = vmatpush3.bf16.msra.mxu1 %v917_v20 }
  0xf6   :  { %880 = vmatprep.subr.bf16.mxu1 %v925_v16 }
  0xf9   :  { %881 = vmatpush3.bf16.msra.mxu1 %v918_v21 }
  0xfa   :  { %882 = vmatprep.subr.bf16.mxu1 %v925_v16 }
  0xfd   :  { %883 = vmatpush3.bf16.msra.mxu1 %v919_v22 }
  0xfe   :  { %884 = vmatprep.subr.bf16.mxu1 %v925_v16 }
 0x101   :  { %885 = vmatpush3.bf16.msra.mxu1 %v920_v23 }
 0x1b7   :  { %v840_v51 = vpop.f32.mrb[0].mxu1 }
 0x1b8   :  { %v279_v52 = vadd.f32 %v840_v51, %v714_v50  ;;  %v270_v53 = vpop.f32.mrb[1].mxu1 }
 0x1b9   :  { %v271_v54 = vadd.f32 %v714_v50, %v270_v53  ;;  %v841_v55 = vpop.f32.mrb[2].mxu1 }
 0x1ba   :  { %v282_v56 = vadd.f32 %v841_v55, %v714_v50  ;;  %v273_v57 = vpop.f32.mrb[3].mxu1  ;;  %v303_v59 = vmax.f32 %v279_v52, 0.0 }
 0x1bb   :  { %v274_v58 = vadd.f32 %v714_v50, %v273_v57  ;;  %v301_v61 = vmax.f32 %v271_v54, 0.0 }
 0x1bc   :  { %v304_v60 = vmax.f32 %v282_v56, 0.0 }
 0x1bd   :  { %v302_v62 = vmax.f32 %v274_v58, 0.0 }
 0x1be   :  { %v310_v63 = vpack.c.bf16 %v304_v60, %v303_v59 }
 0x1bf   :  { %v309_v0 = vpack.c.bf16 %v302_v62, %v301_v61  ;;  %v844_v1 = vpop.f32.mrb[4].mxu1 }
 0x1c0   :  { %v295_v2 = vadd.f32 %v844_v1, %v714_v50  ;;  %v286_v3 = vpop.f32.mrb[5].mxu1 }
 0x1c1   :  { %v287_v4 = vadd.f32 %v714_v50, %v286_v3  ;;  %v845_v5 = vpop.f32.mrb[6].mxu1  ;;  %862 = vmatprep.mubr.bf16.mxu0 %v309_v0 }
 0x1c2   :  { %v298_v6 = vadd.f32 %v845_v5, %v714_v50  ;;  %v289_v7 = vpop.f32.mrb[7].mxu1  ;;  %863 = vmatmul.mubr.bf16.vlgmr.msra.gmra.mrb[8].mxu0 %v310_v63  ;;  %v307_v9 = vmax.f32 %v295_v2, 0.0 }
 0x1c3   :  { %v290_v8 = vadd.f32 %v714_v50, %v289_v7  ;;  %v305_v11 = vmax.f32 %v287_v4, 0.0 }
 0x1c4   :  { %v308_v10 = vmax.f32 %v298_v6, 0.0 }
 0x1c5   :  { %v306_v12 = vmax.f32 %v290_v8, 0.0 }
 0x1c6   :  { %v312_v13 = vpack.c.bf16 %v308_v10, %v307_v9 }
 0x1c7   :  { %v311_v14 = vpack.c.bf16 %v306_v12, %v305_v11 }
 0x1c9   :  { %866 = vmatprep.mubr.bf16.mxu0 %v311_v14 }
 0x1ca   :  { %867 = vmatmul.mubr.bf16.gmra.mrb[12].mxu0 %v312_v13 }
 0x295   :  { %v864_v25 = vpop.f32.mrb[8].mxu0 }
 0x296   :  { %v429_v26 = vadd.f32 %v864_v25, %v740_v24  ;;  %v420_v27 = vpop.f32.mrb[9].mxu0 }
 0x297   :  { %v421_v28 = vadd.f32 %v740_v24, %v420_v27  ;;  %v865_v29 = vpop.f32.mrb[10].mxu0 }
 0x298   :  { %v453_v30 = vmax.f32 %v429_v26, 0.0  ;;  %v432_v31 = vadd.f32 %v865_v29, %v740_v24  ;;  %v423_v32 = vpop.f32.mrb[11].mxu0 }
 0x299   :  { %v451_v33 = vmax.f32 %v421_v28, 0.0  ;;  %v424_v34 = vadd.f32 %v740_v24, %v423_v32 }
 0x29a   :  { %v768_v35 = vpack.c.bf16 %v453_v30, %v453_v30  ;;  %v454_v36 = vmax.f32 %v432_v31, 0.0 }
 0x29b   :  { %v766_v37 = vpack.c.bf16 %v451_v33, %v451_v33  ;;  %v452_v38 = vmax.f32 %v424_v34, 0.0 }
 0x29c   :  { %v494_v39 = vunpack.c.l.bf16 %v768_v35  ;;  %v769_v40 = vpack.c.bf16 %v454_v36, %v454_v36 }
 0x29d   :  { %v492_v41 = vunpack.c.l.bf16 %v766_v37  ;;  %v767_v42 = vpack.c.bf16 %v452_v38, %v452_v38  ;;  %v868_v43 = vpop.f32.mrb[12].mxu0 }
 0x29e   :  { %v512_v44 = vrot.slane %v494_v39, 4  ;;  %v495_v45 = vunpack.c.l.bf16 %v769_v40  ;;  %v445_v46 = vadd.f32 %v868_v43, %v740_v24  ;;  %v436_v47 = vpop.f32.mrb[13].mxu0 }
 0x29f   :  { %v500_v48 = vrot.slane %v492_v41, 4  ;;  %v493_v49 = vunpack.c.l.bf16 %v767_v42  ;;  %v437_v50 = vadd.f32 %v740_v24, %v436_v47  ;;  %v869_v51 = vpop.f32.mrb[14].mxu0 }
 0x2a0   :  { %v513_v52 = vadd.f32 %v512_v44, %v494_v39  ;;  %v518_v53 = vrot.slane %v495_v45, 4  ;;  %v457_v54 = vmax.f32 %v445_v46, 0.0  ;;  %v448_v55 = vadd.f32 %v869_v51, %v740_v24  ;;  %v439_v56 = vpop.f32.mrb[15].mxu0 }
 0x2a1   :  { %v501_v57 = vadd.f32 %v500_v48, %v492_v41  ;;  %v506_v58 = vrot.slane %v493_v49, 4  ;;  %v455_v59 = vmax.f32 %v437_v50, 0.0  ;;  %v440_v60 = vadd.f32 %v740_v24, %v439_v56 }
 0x2a2   :  { %v514_v61 = vrot.slane %v513_v52, 2  ;;  %v519_v62 = vadd.f32 %v518_v53, %v495_v45  ;;  %v772_v63 = vpack.c.bf16 %v457_v54, %v457_v54  ;;  %v458_v0 = vmax.f32 %v448_v55, 0.0 }
 0x2a3   :  { %v502_v1 = vrot.slane %v501_v57, 2  ;;  %v507_v2 = vadd.f32 %v506_v58, %v493_v49  ;;  %v770_v3 = vpack.c.bf16 %v455_v59, %v455_v59  ;;  %v456_v4 = vmax.f32 %v440_v60, 0.0  ;;  %v757_v58 = vld [vmem:[%s1079_s6] ss:$0 sm:$0xff] }
 0x2a4   :  { %v515_v5 = vadd.f32 %v514_v61, %v513_v52  ;;  %v520_v6 = vrot.slane %v519_v62, 2  ;;  %v498_v7 = vunpack.c.l.bf16 %v772_v63  ;;  %v773_v8 = vpack.c.bf16 %v458_v0, %v458_v0 }
 0x2a5   :  { %v503_v9 = vadd.f32 %v502_v1, %v501_v57  ;;  %v508_v10 = vrot.slane %v507_v2, 2  ;;  %v496_v11 = vunpack.c.l.bf16 %v770_v3  ;;  %v771_v12 = vpack.c.bf16 %v456_v4, %v456_v4 }
 0x2a6   :  { %v521_v13 = vadd.f32 %v520_v6, %v519_v62  ;;  %v536_v14 = vrot.slane %v498_v7, 4  ;;  %v499_v15 = vunpack.c.l.bf16 %v773_v8  ;;  %v516_v20 = vrot.slane %v515_v5, 1 }
 0x2a7   :  { %v504_v16 = vrot.slane %v503_v9, 1  ;;  %v509_v17 = vadd.f32 %v508_v10, %v507_v2  ;;  %v524_v18 = vrot.slane %v496_v11, 4  ;;  %v497_v19 = vunpack.c.l.bf16 %v771_v12 }
 0x2a8   :  { %v537_v21 = vadd.f32 %v536_v14, %v498_v7  ;;  %v542_v22 = vrot.slane %v499_v15, 4  ;;  %v522_v23 = vrot.slane %v521_v13, 1  ;;  %v517_v33 = vadd.f32 %v516_v20, %v515_v5 }
 0x2a9   :  { %v510_v24 = vrot.slane %v509_v17, 1  ;;  %v525_v25 = vadd.f32 %v524_v18, %v496_v11  ;;  %v530_v26 = vrot.slane %v497_v19, 4  ;;  %v505_v29 = vadd.f32 %v504_v16, %v503_v9 }
 0x2aa   :  { %v538_v27 = vrot.slane %v537_v21, 2  ;;  %v543_v28 = vadd.f32 %v542_v22, %v499_v15  ;;  %v523_v36 = vadd.f32 %v522_v23, %v521_v13 }
 0x2ab   :  { %v511_v30 = vadd.f32 %v510_v24, %v509_v17  ;;  %v526_v31 = vrot.slane %v525_v25, 2  ;;  %v531_v32 = vadd.f32 %v530_v26, %v497_v19 }
 0x2ac   :  { %v539_v34 = vadd.f32 %v538_v27, %v537_v21  ;;  %v544_v35 = vrot.slane %v543_v28, 2 }
 0x2ad   :  { %v557_v37 = vsel %vm556_vm2, %v511_v30, %v505_v29  ;;  %v527_v38 = vadd.f32 %v526_v31, %v525_v25  ;;  %v532_v39 = vrot.slane %v531_v32, 2 }
 0x2ae   :  { %v559_v40 = vsel %vm558_vm3, %v517_v33, %v557_v37  ;;  %v545_v41 = vadd.f32 %v544_v35, %v543_v28  ;;  %v540_v45 = vrot.slane %v539_v34, 1 }
 0x2af   :  { %v528_v42 = vrot.slane %v527_v38, 1  ;;  %v561_v43 = vsel %vm560_vm4, %v523_v36, %v559_v40  ;;  %v533_v44 = vadd.f32 %v532_v39, %v531_v32 }
 0x2b0   :  { %v546_v47 = vrot.slane %v545_v41, 1  ;;  %v541_v51 = vadd.f32 %v540_v45, %v539_v34 }
 0x2b1   :  { %v529_v46 = vadd.f32 %v528_v42, %v527_v38  ;;  %v534_v48 = vrot.slane %v533_v44, 1 }
 0x2b2   :  { %v547_v52 = vadd.f32 %v546_v47, %v545_v41 }
 0x2b3   :  { %v563_v49 = vsel %vm562_vm5, %v529_v46, %v561_v43  ;;  %v535_v50 = vadd.f32 %v534_v48, %v533_v44 }
 0x2b5   :  { %v565_v53 = vsel %vm564_vm6, %v535_v50, %v563_v49 }
 0x2b6   :  { %v567_v54 = vsel %vm566_vm7, %v541_v51, %v565_v53 }
 0x2b7   :  { %v569_v55 = vsel %vm568_vm8, %v547_v52, %v567_v54 }
 0x2b8   :  { %v577_v56 = vmul.f32 0.125, %v569_v55 }
 0x2ba   :  { %v578_v57 = vpack.c.bf16 %v577_v56, %v577_v56 }
 0x2bc   :  { %887 = vmatmul.mubr.bf16.vlgmr.msra.gmra.mrb[8].mxu1 %v578_v57 }
 0x38f   :  { %v684_v59 = vpop.f32.mrb[8].mxu1 }
 0x390   :  { %v685_v60 = vadd.f32 %v757_v58, %v684_v59  ;;  %v888_v61 = vpop.f32.mrb[9].mxu1 }
 0x391   :  { %v687_v62 = vpop.f32.mrb[10].mxu1 }
 0x392   :  { %690 = vmax.xlane.f32.xlu0 %v685_v60  ;;  %v889_v63 = vpop.f32.mrb[11].mxu1 }
 0x41f   :  { %v691_v0 = vpop.xlane.xlu0 %690 }
 0x420   :  { %v692_v1 = vsub.f32 %v685_v60, %v691_v0 }
 0x422   :  { %v693_v2 = vmul.f32 1.442695, %v692_v1 }
 0x424   :  { %921 = vpow2.f32 %v693_v2 }
 0x42e   :  { %v922_v3 = vpop.eup %921 }
 0x42f   :  { %695 = vadd.xlane.f32.xlu0 %v922_v3 }
 0x4bc   :  { %v696_v4 = vpop.xlane.xlu0 %695 }
 0x4bd   :  { %923 = vrcp.f32 %v696_v4 }
 0x4c7   :  { %v924_v5 = vpop.eup %923 }
 0x4c8   :  { %v698_v6 = vmul.f32 %v924_v5, %v922_v3 }
 0x4ca   :  { %699 = vst [vmem:[%s1080_s7] sm:$0xff] %v698_v6 }

</bundles_post_ra>
